<compile_context>
chip_gen: v6e
topology: v6e:2x2x1
jax: 0.10.0
libtpu: 0.0.40
codegen_flags: <defaults>
</compile_context>

<pallas_src>
import functools

import jax
import jax.numpy as jnp
from jax.experimental import pallas as pl
from jax.experimental.pallas import tpu as pltpu


def _round_up(x, m):
    return ((x + m - 1) // m) * m


def _pick_tile(padded, cap):
    """Largest multiple-of-128 divisor of `padded` (itself a multiple of 128) <= cap."""
    nb = padded // 128
    max_blocks = max(1, cap // 128)
    if nb <= max_blocks:
        return padded
    for d in range(max_blocks, 0, -1):
        if nb % d == 0:
            return 128 * d
    return 128


# ----------------------------- kernels ---------------------------------------


def _gcn_kernel_single_k(x_ref, w_ref, b_ref, o_ref, *, acti):
    # x_ref: (TM, K)  w_ref: (K, TN)  b_ref: (1, TN)  o_ref: (TM, TN)
    out = jnp.dot(x_ref[...], w_ref[...], preferred_element_type=jnp.float32)
    out = out + b_ref[...]
    if acti:
        out = jnp.maximum(out, 0.0)
    o_ref[...] = out.astype(o_ref.dtype)


def _gcn_kernel_multi_k_f32(x_ref, w_ref, b_ref, o_ref, *, acti):
    # f32 output: accumulate directly into the K-resident output block.
    k = pl.program_id(2)

    @pl.when(k == 0)
    def _():
        o_ref[...] = jnp.zeros_like(o_ref)

    o_ref[...] += jnp.dot(
        x_ref[...], w_ref[...], preferred_element_type=jnp.float32
    )

    @pl.when(k == pl.num_programs(2) - 1)
    def _():
        out = o_ref[...] + b_ref[...]
        if acti:
            out = jnp.maximum(out, 0.0)
        o_ref[...] = out


def _gcn_kernel_multi_k_acc(x_ref, w_ref, b_ref, o_ref, acc_ref, *, acti):
    # Non-f32 output: accumulate in a f32 VMEM scratch, cast in the epilogue.
    k = pl.program_id(2)

    @pl.when(k == 0)
    def _():
        acc_ref[...] = jnp.zeros_like(acc_ref)

    acc_ref[...] += jnp.dot(
        x_ref[...], w_ref[...], preferred_element_type=jnp.float32
    )

    @pl.when(k == pl.num_programs(2) - 1)
    def _():
        out = acc_ref[...] + b_ref[...]
        if acti:
            out = jnp.maximum(out, 0.0)
        o_ref[...] = out.astype(o_ref.dtype)


# ----------------------------- wrapper ----------------------------------------


def gcn_layer(F, weight, bias, acti=True, *, tm=256, tn=256, tk=512):
    """F: (..., in_dim); weight: (out_dim, in_dim); bias: (out_dim,) — nn.Linear."""
    in_dim = F.shape[-1]
    out_dim = weight.shape[0]
    lead = F.shape[:-1]
    dtype = F.dtype

    x = F.reshape(-1, in_dim)  # (M, in_dim)
    M = x.shape[0]

    # --- tile sizing ----------------------------------------------------------
    itemsize = jnp.dtype(dtype).itemsize
    sub = {4: 8, 2: 16, 1: 32}.get(itemsize, 8)  # per-dtype sublane multiple

    K_pad = _round_up(in_dim, 128)
    N_pad = _round_up(out_dim, 128)

    TK = _pick_tile(K_pad, tk)          # divides K_pad exactly
    TN = _pick_tile(N_pad, tn)          # divides N_pad exactly (lane-dense stores)
    TM = min(_round_up(tm, sub), _round_up(M, sub))

    mt = pl.cdiv(M, TM)                 # M is NOT padded; last tile may be partial
    nt = N_pad // TN
    kt = K_pad // TK

    # --- operand prep: pad only where required --------------------------------
    if K_pad != in_dim:                 # zeros are exact for the K accumulation
        x = jnp.pad(x, ((0, 0), (0, K_pad - in_dim)))
    w_p = jnp.pad(
        weight.T, ((0, K_pad - in_dim), (0, N_pad - out_dim))
    )                                   # (K_pad, N_pad)
    b_p = jnp.pad(
        bias.reshape(1, -1), ((0, 0), (0, N_pad - out_dim))
    )                                   # (1, N_pad)

    # --- grid / specs ----------------------------------------------------------
    if kt == 1:
        kernel = functools.partial(_gcn_kernel_single_k, acti=acti)
        grid = (mt, nt)
        in_specs = [
            pl.BlockSpec((TM, K_pad), lambda i, j: (i, 0)),
            pl.BlockSpec((K_pad, TN), lambda i, j: (0, j)),
            pl.BlockSpec((1, TN), lambda i, j: (0, j)),
        ]
        out_specs = pl.BlockSpec((TM, TN), lambda i, j: (i, j))
        scratch_shapes = []
        dims = ("parallel", "parallel")
    else:
        if jnp.dtype(dtype) == jnp.float32:
            kernel = functools.partial(_gcn_kernel_multi_k_f32, acti=acti)
            scratch_shapes = []
        else:
            kernel = functools.partial(_gcn_kernel_multi_k_acc, acti=acti)
            scratch_shapes = [pltpu.VMEM((TM, TN), jnp.float32)]
        grid = (mt, nt, kt)
        in_specs = [
            pl.BlockSpec((TM, TK), lambda i, j, k: (i, k)),
            pl.BlockSpec((TK, TN), lambda i, j, k: (k, j)),
            pl.BlockSpec((1, TN), lambda i, j, k: (0, j)),
        ]
        out_specs = pl.BlockSpec((TM, TN), lambda i, j, k: (i, j))
        dims = ("parallel", "parallel", "arbitrary")

    out = pl.pallas_call(
        kernel,
        out_shape=jax.ShapeDtypeStruct((M, N_pad), dtype),
        grid=grid,
        in_specs=in_specs,
        out_specs=out_specs,
        scratch_shapes=scratch_shapes,
        compiler_params=pltpu.CompilerParams(dimension_semantics=dims),
    )(x, w_p, b_p)

    if N_pad != out_dim:
        out = out[:, :out_dim]
    return out.reshape(*lead, out_dim)


# ----------------------------- test -------------------------------------------

if __name__ == "__main__":
    key = jax.random.PRNGKey(0)

    # ---- Test 1: original toy shapes (single-K fast path) --------------------
    batch, nodes, in_dim, out_dim = 2, 8, 32, 32
    k_f, k_w, k_b = jax.random.split(key, 3)
    F = jax.random.normal(k_f, (batch, nodes, in_dim), dtype=jnp.float32)
    bound = 1.0 / jnp.sqrt(jnp.float32(in_dim))
    weight = jax.random.uniform(k_w, (out_dim, in_dim), jnp.float32, -bound, bound)
    bias = jax.random.uniform(k_b, (out_dim,), jnp.float32, -bound, bound)

    out = jax.block_until_ready(gcn_layer(F, weight, bias, acti=True))
    ref = jnp.maximum(F @ weight.T + bias, 0.0)
    assert out.shape == (batch, nodes, out_dim)
    assert jnp.allclose(out, ref, atol=1e-5, rtol=1e-5)

    out_noact = jax.block_until_ready(gcn_layer(F, weight, bias, acti=False))
    ref_noact = F @ weight.T + bias
    assert jnp.allclose(out_noact, ref_noact, atol=1e-5, rtol=1e-5)

    # ---- Test 2: exercise M/N/K tiling, partial M tile, K zero-padding -------
    batch2, nodes2, in2, out2 = 2, 13, 320, 256      # M=26 (partial tile), K_pad=384
    k_f2, k_w2, k_b2 = jax.random.split(jax.random.PRNGKey(1), 3)
    F2 = jax.random.normal(k_f2, (batch2, nodes2, in2), dtype=jnp.float32)
    b2 = 1.0 / jnp.sqrt(jnp.float32(in2))
    W2 = jax.random.uniform(k_w2, (out2, in2), jnp.float32, -b2, b2)
    B2 = jax.random.uniform(k_b2, (out2,), jnp.float32, -b2, b2)

    out2_k = jax.block_until_ready(
        gcn_layer(F2, W2, B2, acti=True, tm=8, tn=128, tk=128)
    )
    ref2 = jnp.maximum(F2 @ W2.T + B2, 0.0)
    assert out2_k.shape == (batch2, nodes2, out2)
    assert jnp.allclose(out2_k, ref2, atol=1e-4, rtol=1e-4)

    # ---- Test 3: bf16 path (multi-K with f32 scratch accumulator) ------------
    F3 = F2.astype(jnp.bfloat16)
    W3 = W2.astype(jnp.bfloat16)
    B3 = B2.astype(jnp.bfloat16)
    out3 = jax.block_until_ready(
        gcn_layer(F3, W3, B3, acti=True, tm=8, tn=128, tk=128)
    )
    ref3 = jnp.maximum(
        F3.astype(jnp.float32) @ W3.astype(jnp.float32).T
        + B3.astype(jnp.float32),
        0.0,
    )
    assert out3.shape == (batch2, nodes2, out2)
    assert jnp.allclose(out3.astype(jnp.float32), ref3, atol=2e-2, rtol=2e-2)

    print("KERNEL_OK")
</pallas_src>

<mosaic_0001>
module attributes {stable_mosaic.version = 11 : i64} {
  func.func @_gcn_kernel_single_k(%arg0: i32, %arg1: i32, %arg2: memref<16x128xf32, #tpu.memory_space<vmem>>, %arg3: memref<128x128xf32, #tpu.memory_space<vmem>>, %arg4: memref<1x128xf32, #tpu.memory_space<vmem>>, %arg5: memref<16x128xf32, #tpu.memory_space<vmem>>) attributes {dimension_semantics = [#tpu.dimension_semantics<parallel>, #tpu.dimension_semantics<parallel>], iteration_bounds = array<i64: 1, 1>, scalar_prefetch = 0 : i64, scratch_operands = 0 : i64, tpu.core_type = #tpu.core_type<tc>, window_params = [{transform_indices = @transform_0, window_bounds = array<i64: 16, 128>}, {transform_indices = @transform_1, window_bounds = array<i64: 128, 128>}, {transform_indices = @transform_2, window_bounds = array<i64: 1, 128>}, {transform_indices = @transform_3, window_bounds = array<i64: 16, 128>}]} {
    %c0 = arith.constant 0 : index
    %c0_0 = arith.constant 0 : index
    %0 = vector.load %arg2[%c0, %c0_0] : memref<16x128xf32, #tpu.memory_space<vmem>>, vector<16x128xf32>
    %c0_1 = arith.constant 0 : index
    %c0_2 = arith.constant 0 : index
    %1 = vector.load %arg3[%c0_1, %c0_2] : memref<128x128xf32, #tpu.memory_space<vmem>>, vector<128x128xf32>
    %cst = arith.constant dense<0.000000e+00> : vector<16x128xf32>
    %2 = tpu.matmul %0, %1, %cst {dimension_numbers = #tpu.dot_dimension_numbers<[1], [0], [0], [1], [0, 0, 1, 1], [], []>} : vector<16x128xf32>, vector<128x128xf32>, vector<16x128xf32> -> vector<16x128xf32>
    %c0_3 = arith.constant 0 : index
    %c0_4 = arith.constant 0 : index
    %3 = vector.load %arg4[%c0_3, %c0_4] : memref<1x128xf32, #tpu.memory_space<vmem>>, vector<1x128xf32>
    %4 = vector.broadcast %3 : vector<1x128xf32> to vector<16x128xf32>
    %5 = arith.addf %2, %4 : vector<16x128xf32>
    %cst_5 = arith.constant 0.000000e+00 : f32
    %6 = vector.broadcast %cst_5 : f32 to vector<16x128xf32>
    %7 = arith.maximumf %5, %6 : vector<16x128xf32>
    %c0_6 = arith.constant 0 : index
    %c0_7 = arith.constant 0 : index
    %8 = vector.load %arg5[%c0_6, %c0_7] : memref<16x128xf32, #tpu.memory_space<vmem>>, vector<16x128xf32>
    tpu.vector_store %arg5[%c0_6, %c0_7], %7 {strides = array<i32>} : memref<16x128xf32, #tpu.memory_space<vmem>>, vector<16x128xf32>,
    return
  }
  func.func @transform_0(%arg0: i32, %arg1: i32) -> (i32, i32) {
    %c0_i32 = arith.constant 0 : i32
    %c0_i32_0 = arith.constant 0 : i32
    return %arg0, %c0_i32 : i32, i32
  }
  func.func @transform_1(%arg0: i32, %arg1: i32) -> (i32, i32) {
    %c0_i32 = arith.constant 0 : i32
    %c0_i32_0 = arith.constant 0 : i32
    return %c0_i32, %arg1 : i32, i32
  }
  func.func @transform_2(%arg0: i32, %arg1: i32) -> (i32, i32) {
    %c0_i32 = arith.constant 0 : i32
    %c0_i32_0 = arith.constant 0 : i32
    return %c0_i32, %arg1 : i32, i32
  }
  func.func @transform_3(%arg0: i32, %arg1: i32) -> (i32, i32) {
    %c0_i32 = arith.constant 0 : i32
    return %arg0, %arg1 : i32, i32
  }
}

</mosaic_0001>

<bundles_post_ra>
// kernel: tpu_custom_call.1
= control target key start
LH: loop header
LB: loop body
LE: loop exit
PB: predicated region body
PF: predicated region fallthrough
CT: control target
= control target key end

     0   :  { %8 = vsyncpa [#allocation3], 0  ;;  %s336_s0 = inlined_call_operand.hbm [shape: f32[16,128], index: 0, kind: input, shape index: {}]   ;;  %s337_s1 = inlined_call_operand.hbm [shape: f32[128,128], index: 1, kind: input, shape index: {}]   ;;  %s338_s2 = inlined_call_operand.vmem [shape: f32[1,128], index: 2, kind: input, shape index: {}]   ;;  %s339_s3 = inlined_call_operand.hbm [shape: f32[16,128], index: 3, kind: output, shape index: {}]  }
   0x1   :  { %9 = vsyncpa [#allocation6], 0 }
   0x2   :  { %10 = vsyncpa [#allocation4], 0  ;;  %s290_s12 = smov [#allocation2]  }
   0x3   :  { %s16_s13 = sshll.u32 %s290_s12, 4  ;;  %s17_s13 = int_to_ptr.vmem [resolvable:$true] %s16_s13 }
   0x4   :  { %s232_s14 = scalar_lea.vmem %s17_s13, 256  ;;  %p237_p1 = scmp.lt.s32.totalorder %s17_s13, %s17_s13 }
   0x5   :  { %p233_p0 = scmp.ne.s32.totalorder %s17_s13, %s232_s14  ;;  %p238_p2 = scmp.lt.s32.totalorder %s232_s14, %s232_s14 }
   0x7   :  { %p239_p3 = por %p238_p2, %p237_p1 }
   0x9   :  { %p240_p4 = pnand %p239_p3, %p233_p0 }
   0xb   :  { %243 = shalt.err (!%p240_p4)
}
   0xc   :  { %s291_s15 = smov 128   ;;  %s292_s16 = smov 8  }
   0xd   :  { %22 = dma.hbm_to_vmem [thread:$0]  %s336_s0, 256, %s17_s13, [#allocation3], %s291_s15, %s291_s15, %s292_s16  }
   0xe   :  { %s293_s19 = smov [#allocation5]  }
   0xf   :  { %s28_s20 = sshll.u32 %s293_s19, 4  ;;  %s29_s20 = int_to_ptr.vmem [resolvable:$true] %s28_s20 }
  0x10   :  { %s252_s21 = scalar_lea.vmem %s29_s20, 2048  ;;  %p257_p6 = scmp.lt.s32.totalorder %s29_s20, %s29_s20 }
  0x11   :  { %p253_p5 = scmp.ne.s32.totalorder %s29_s20, %s252_s21  ;;  %p258_p7 = scmp.lt.s32.totalorder %s252_s21, %s252_s21 }
  0x13   :  { %p259_p8 = por %p258_p7, %p257_p6 }
  0x15   :  { %p260_p9 = pnand %p259_p8, %p253_p5 }
  0x17   :  { %263 = shalt.err (!%p260_p9)
}
  0x18   :  { %34 = dma.hbm_to_vmem [thread:$0]  %s337_s1, 2048, %s29_s20, [#allocation6], %s291_s15, %s291_s15, %s292_s16  }
  0x19   :  { %284 = dma.done.wait [#allocation3], 256  }
  0x1a   :  { %285 = vsyncadd [#allocation3], 4294967040 }
  0x1b   :  { %286 = dma.done.wait [#allocation6], 2048  }
  0x1c   :  { %287 = vsyncadd [#allocation6], 4294965248  ;;  %v60_v0 = vld [vmem:[#allocation5 + $0x78] sm:$0xff]  ;;  %v59_v1 = vld [vmem:[#allocation5 + $0x70] sm:$0xff]  ;;  %s294_s24 = smov [#allocation7]  }
  0x1d   :  { %184 = vmatprep.subr.mxu0 %v60_v0  ;;  %v58_v2 = vld [vmem:[#allocation5 + $0x68] sm:$0xff]  ;;  %v57_v3 = vld [vmem:[#allocation5 + $0x60] sm:$0xff]  ;;  %v43_v4 = vld [vmem:[#allocation2] sm:$0xff]  ;;  %s152_s25 = sshll.u32 %s294_s24, 4  ;;  %s153_s25 = int_to_ptr.vmem [resolvable:$true] %s152_s25 }
  0x1e   :  { %185 = vmatpush3.msra.mxu0 %v60_v0  ;;  %v56_v5 = vld [vmem:[#allocation5 + $0x58] sm:$0xff]  ;;  %216 = vmatprep.mubr.f32.mxu0 %v43_v4  ;;  %v55_v6 = vld [vmem:[#allocation5 + $0x50] sm:$0xff]  ;;  %v54_v7 = vld [vmem:[#allocation5 + $0x48] sm:$0xff]  ;;  %s264_s26 = scalar_lea.vmem %s153_s25, 256  ;;  %p269_p11 = scmp.lt.s32.totalorder %s153_s25, %s153_s25 }
  0x1f   :  { %186 = vmatprep.subr.mxu0 %v59_v1  ;;  %v53_v8 = vld [vmem:[#allocation5 + $0x40] sm:$0xff]  ;;  %v52_v9 = vld [vmem:[#allocation5 + $0x38] sm:$0xff]  ;;  %v51_v10 = vld [vmem:[#allocation5 + $0x30] sm:$0xff]  ;;  %p265_p10 = scmp.ne.s32.totalorder %s153_s25, %s264_s26  ;;  %p270_p12 = scmp.lt.s32.totalorder %s264_s26, %s264_s26 }
  0x20   :  { %187 = vmatpush3.msra.mxu0 %v59_v1  ;;  %v50_v11 = vld [vmem:[#allocation5 + $0x28] sm:$0xff]  ;;  %v49_v12 = vld [vmem:[#allocation5 + $0x20] sm:$0xff]  ;;  %v48_v13 = vld [vmem:[#allocation5 + $0x18] sm:$0xff] }
  0x21   :  { %188 = vmatprep.subr.mxu0 %v58_v2  ;;  %v47_v14 = vld [vmem:[#allocation5 + $0x10] sm:$0xff]  ;;  %v46_v15 = vld [vmem:[#allocation5 + $0x8] sm:$0xff]  ;;  %v45_v16 = vld [vmem:[#allocation5] sm:$0xff]  ;;  %p271_p13 = por %p270_p12, %p269_p11 }
  0x22   :  { %189 = vmatpush3.msra.mxu0 %v58_v2  ;;  %v44_v17 = vld [vmem:[#allocation2 + $0x8] sm:$0xff]  ;;  %v165_v18 = vld [vmem:[%s338_s2] ss:$0 sm:$0xff] }
  0x23   :  { %190 = vmatprep.subr.mxu0 %v57_v3  ;;  %p272_p0 = pnand %p271_p13, %p265_p10 }
  0x24   :  { %191 = vmatpush3.msra.mxu0 %v57_v3 }
  0x25   :  { %192 = vmatprep.subr.mxu0 %v56_v5 }
  0x26   :  { %193 = vmatpush3.msra.mxu0 %v56_v5 }
  0x27   :  { %194 = vmatprep.subr.mxu0 %v55_v6 }
  0x28   :  { %195 = vmatpush3.msra.mxu0 %v55_v6 }
  0x29   :  { %196 = vmatprep.subr.mxu0 %v54_v7 }
  0x2a   :  { %197 = vmatpush3.msra.mxu0 %v54_v7 }
  0x2b   :  { %198 = vmatprep.subr.mxu0 %v53_v8 }
  0x2c   :  { %199 = vmatpush3.msra.mxu0 %v53_v8 }
  0x2d   :  { %200 = vmatprep.subr.mxu0 %v52_v9 }
  0x2e   :  { %201 = vmatpush3.msra.mxu0 %v52_v9 }
  0x2f   :  { %202 = vmatprep.subr.mxu0 %v51_v10 }
  0x30   :  { %203 = vmatpush3.msra.mxu0 %v51_v10 }
  0x31   :  { %204 = vmatprep.subr.mxu0 %v50_v11 }
  0x32   :  { %205 = vmatpush3.msra.mxu0 %v50_v11 }
  0x33   :  { %206 = vmatprep.subr.mxu0 %v49_v12 }
  0x34   :  { %207 = vmatpush3.msra.mxu0 %v49_v12 }
  0x35   :  { %208 = vmatprep.subr.mxu0 %v48_v13 }
  0x36   :  { %209 = vmatpush3.msra.mxu0 %v48_v13 }
  0x37   :  { %210 = vmatprep.subr.mxu0 %v47_v14 }
  0x38   :  { %211 = vmatpush3.msra.mxu0 %v47_v14 }
  0x39   :  { %212 = vmatprep.subr.mxu0 %v46_v15 }
  0x3a   :  { %213 = vmatpush3.msra.mxu0 %v46_v15 }
  0x3b   :  { %214 = vmatprep.subr.mxu0 %v45_v16 }
  0x3c   :  { %215 = vmatpush3.msra.mxu0 %v45_v16 }
  0x3d   :  { %217 = vmatmul.mubr.f32.vlgmr.msra.gmra.mxu0 %v44_v17 }
  0xfd   :  { %v218_v19 = vpop.f32.mrf.mxu0 }
  0xfe   :  { %v140_v20 = vadd.f32 %v218_v19, %v165_v18 }
  0xff   :  { %v134_v21 = vpop.f32.mrf.mxu0 }
 0x100   :  { %v144_v22 = vmax.f32 %v140_v20, 0.0  ;;  %v135_v23 = vadd.f32 %v165_v18, %v134_v21 }
 0x102   :  { %146 = vst [vmem:[#allocation7 + $0x8] sm:$0xff] %v144_v22  ;;  %v143_v24 = vmax.f32 %v135_v23, 0.0 }
 0x104   :  { %145 = vst [vmem:[#allocation7] sm:$0xff] %v143_v24 }
 0x105   :  { %275 = shalt.err (!%p272_p0)
}
 0x106   :  { %158 = dma.vmem_to_hbm [thread:$0]  %s153_s25, 256, %s339_s3, [#allocation4], %s291_s15, %s291_s15, %s292_s16  }
 0x107   :  { %288 = dma.done.wait [#allocation4], 256  }
 0x108   :  { %289 = vsyncadd [#allocation4], 4294967040 }
 0x109   :  { %162 = vsyncpa [#allocation3], 1 }
 0x10a   :  { %163 = vsyncpa [#allocation6], 1 }
 0x10b   :  { %164 = vsyncpa [#allocation4], 1 }

</bundles_post_ra>
